<compile_context>
chip_gen: v6e
topology: v6e:2x2x1
jax: 0.10.0
libtpu: 0.0.40
codegen_flags: <defaults>
</compile_context>

<pallas_src>
import jax
import jax.numpy as jnp
from jax import lax
from jax.experimental import pallas as pl
from jax.experimental.pallas import tpu as pltpu

FOCAL_ALPHA = 0.25
FOCAL_GAMMA = 2.0          # hard-coded below as (1 - p_t)^2
PIXEL_SCALE = 976.0
NO_OBJECT_CATEGORY = 1     # == num_classes (C), so the no-object one-hot column is dropped


def _acos_approx(x):
    # Abramowitz & Stegun 4.4.45 (|err| < 7e-5 rad), extended to [-1, 1].
    ax = jnp.abs(x)
    poly = 1.5707288 + ax * (-0.2121144 + ax * (0.0742610 + ax * (-0.0187293)))
    r = jnp.sqrt(jnp.maximum(1.0 - ax, 0.0)) * poly
    return jnp.where(x < 0.0, jnp.pi - r, r)


# ----------------------------------------------------------------------------
# Fused kernel: focal loss + cardinality + matched screw losses
# ----------------------------------------------------------------------------
def _make_fused_kernel(B, Q, QPAD, TMAX, NPAD, num_screws):
    inv_num = 1.0 / float(num_screws)
    inv_b = 1.0 / float(B)

    def kernel(tgt_len_ref, logits_ref, src_ref, tgt_ref, out_ref):
        f32 = jnp.float32
        logits = logits_ref[...].astype(f32)                       # [B, QPAD]

        qiota = lax.broadcasted_iota(jnp.int32, (B, QPAD), 1)
        biota = lax.broadcasted_iota(jnp.int32, (B, QPAD), 0)

        # per-row target count, broadcast across lanes (lengths ride SMEM)
        len_bq = jnp.zeros((B, QPAD), f32)
        for b in range(B):
            len_bq = jnp.where(biota == b, tgt_len_ref[b].astype(f32), len_bq)

        q_valid = (qiota < Q).astype(f32)                          # mask lane padding
        # identity matching + single "screw" class (label 0):
        # onehot(class 0) == (query index < #targets of that batch)
        t = (qiota.astype(f32) < len_bq).astype(f32)

        # ---- sigmoid focal loss (alpha=0.25, gamma=2) ----
        prob = jax.nn.sigmoid(logits)
        ce = jnp.maximum(logits, 0.0) - logits * t + jnp.log(1.0 + jnp.exp(-jnp.abs(logits)))
        p_t = prob * t + (1.0 - prob) * (1.0 - t)
        one_m = 1.0 - p_t
        focal = (FOCAL_ALPHA * t + (1.0 - FOCAL_ALPHA) * (1.0 - t)) * ce * one_m * one_m
        focal = focal * q_valid
        # loss.mean(1).sum() / num_screws * Q  ==  sum(loss) / num_screws   (C == 1)
        loss_ce = jnp.sum(focal, keepdims=True) * f32(inv_num)     # (1, 1)

        # ---- cardinality error ----
        card_pred = jnp.sum((logits > 0.0).astype(f32) * q_valid, axis=1, keepdims=True)  # [B,1]
        card_err = jnp.sum(jnp.abs(card_pred - len_bq[:, 0:1]), keepdims=True) * f32(inv_b)

        # ---- matched screw losses, layout [4, NPAD]: coords on sublanes ----
        src = src_ref[...].astype(f32)                             # [4, NPAD] normalized
        tgt = tgt_ref[...].astype(f32)
        xh_s, yh_s, xt_s, yt_s = src[0:1, :], src[1:2, :], src[2:3, :], src[3:4, :]
        xh_t, yh_t, xt_t, yt_t = tgt[0:1, :], tgt[1:2, :], tgt[2:3, :], tgt[3:4, :]

        # matched-pair mask: column b*TMAX + j is valid iff j < len_b
        col = lax.broadcasted_iota(jnp.int32, (1, NPAD), 1)
        matched = col < 0
        for b in range(B):
            lb = tgt_len_ref[b]
            matched = matched | ((col >= b * TMAX) & (col < b * TMAX + lb))

        half_px = 0.5 * PIXEL_SCALE
        mx_s = (xh_s + xt_s) * half_px
        my_s = (yh_s + yt_s) * half_px
        mx_t = (xh_t + xt_t) * half_px
        my_t = (yh_t + yt_t) * half_px
        l1_mid = jnp.abs(mx_s - mx_t) + jnp.abs(my_s - my_t)       # [1, NPAD]

        # angle between direction vectors (degrees), on normalized coords
        vx_s = xt_s - xh_s
        vy_s = yt_s - yh_s
        vx_t = xt_t - xh_t
        vy_t = yt_t - yh_t
        dot = vx_s * vx_t + vy_s * vy_t
        n1 = jnp.sqrt(vx_s * vx_s + vy_s * vy_s)
        n2 = jnp.sqrt(vx_t * vx_t + vy_t * vy_t)
        cosang = jnp.clip(dot / (n1 * n2 + 1e-8), -1.0, 1.0)
        ang = _acos_approx(cosang) * f32(180.0 / jnp.pi)

        # head / tip Euclidean distances in pixel space
        dxh = (xh_s - xh_t) * PIXEL_SCALE
        dyh = (yh_s - yh_t) * PIXEL_SCALE
        dxt = (xt_s - xt_t) * PIXEL_SCALE
        dyt = (yt_s - yt_t) * PIXEL_SCALE
        head = jnp.sqrt(dxh * dxh + dyh * dyh)
        tip = jnp.sqrt(dxt * dxt + dyt * dyt)

        # invalid-target gating (exact loss_screws condition)
        invalid = (((xh_t >= 1.0) & (xt_t >= 1.0)) | ((xh_t <= 0.0) & (xt_t <= 0.0)) |
                   ((yh_t >= 1.0) & (yt_t >= 1.0)) | ((yh_t <= 0.0) & (yt_t <= 0.0)))
        w = (matched & jnp.logical_not(invalid)).astype(f32)
        n_inv = jnp.sum((matched & invalid).astype(f32), keepdims=True)
        ns = jnp.maximum(f32(float(num_screws)) - n_inv, 1.0)      # clamp >= 1 (avoid NaN/inf)
        inv_ns = pl.reciprocal(ns, approx=True)

        mid_l = jnp.sum(l1_mid * w, keepdims=True) * inv_ns
        ang_l = jnp.sum(ang * w, keepdims=True) * inv_ns
        head_l = jnp.sum(head * w, keepdims=True) * inv_ns
        tip_l = jnp.sum(tip * w, keepdims=True) * inv_ns

        # ---- pack all six scalars into one lane-dense (1, 128) row ----
        lane = lax.broadcasted_iota(jnp.int32, (1, 128), 1)
        zero = jnp.zeros((1, 128), f32)
        row = jnp.where(lane == 0, loss_ce, zero)
        row = row + jnp.where(lane == 1, card_err, zero)
        row = row + jnp.where(lane == 2, mid_l, zero)
        row = row + jnp.where(lane == 3, ang_l, zero)
        row = row + jnp.where(lane == 4, head_l, zero)
        row = row + jnp.where(lane == 5, tip_l, zero)
        out_ref[...] = row

    return kernel


def fused_set_criterion_losses(tgt_lengths_i32, logits_bq_pad, src_screws_t, tgt_screws_t,
                               *, B, Q, QPAD, TMAX, NPAD, num_screws):
    kernel = _make_fused_kernel(B, Q, QPAD, TMAX, NPAD, num_screws)
    bytes_accessed = 4 * (B * QPAD + 8 * NPAD + 128 + B)
    flops = 40 * B * QPAD + 120 * NPAD
    transcendentals = 3 * B * QPAD + 8 * NPAD
    return pl.pallas_call(
        kernel,
        out_shape=jax.ShapeDtypeStruct((1, 128), jnp.float32),
        in_specs=[
            pl.BlockSpec(memory_space=pltpu.MemorySpace.SMEM),   # per-batch target counts
            pl.BlockSpec(memory_space=pltpu.MemorySpace.VMEM),   # logits  [B, QPAD]
            pl.BlockSpec(memory_space=pltpu.MemorySpace.VMEM),   # matched pred screws [4, NPAD]
            pl.BlockSpec(memory_space=pltpu.MemorySpace.VMEM),   # target screws       [4, NPAD]
        ],
        out_specs=pl.BlockSpec(memory_space=pltpu.MemorySpace.VMEM),
        cost_estimate=pl.CostEstimate(flops=flops, transcendentals=transcendentals,
                                      bytes_accessed=bytes_accessed),
    )(tgt_lengths_i32, logits_bq_pad, src_screws_t, tgt_screws_t)


# ----------------------------------------------------------------------------
# Forward pass (glue: layout packing + logging-only class precision)
# ----------------------------------------------------------------------------
def set_criterion_forward(outputs, targets):
    pred_logits = outputs['pred_logits']   # [B, Q, 1]
    pred_screws = outputs['pred_screws']   # [B, Q, 4], normalized coords
    B, Q, C = pred_logits.shape
    assert C == 1

    # TODO(synk): Hungarian matcher (scipy linear_sum_assignment) has no clean Pallas
    # equivalent; deterministic identity matching (target j <-> query j) is used instead.
    lens = [int(t['labels'].shape[0]) for t in targets]
    TMAX = max(lens + [1])
    assert TMAX <= Q
    num_screws = float(max(sum(lens), 1))
    # NOTE: num_screws / TMAX are compile-time constants -> varying target counts retrace.

    QPAD = ((Q + 127) // 128) * 128
    NPAD = max(((B * TMAX + 127) // 128) * 128, 128)

    # lane-dense logits slab [B, QPAD]
    logits_bq = pred_logits[:, :, 0]
    if QPAD != Q:
        logits_bq = jnp.pad(logits_bq, ((0, 0), (0, QPAD - Q)))

    # matched pred screws (identity matching -> first TMAX queries), coords on sublanes
    src_mat = pred_screws[:, :TMAX, :]                            # [B, TMAX, 4]
    src_t = src_mat.reshape(B * TMAX, 4).T                        # [4, B*TMAX]
    src_t = jnp.pad(src_t, ((0, 0), (0, NPAD - B * TMAX)))

    # target screws, per-batch padded to TMAX, same layout
    tgt_rows = []
    for t, n in zip(targets, lens):
        s = t['screws']
        if n < TMAX:
            s = jnp.pad(s, ((0, TMAX - n), (0, 0)))
        tgt_rows.append(s)
    tgt_mat = jnp.stack(tgt_rows, axis=0)                         # [B, TMAX, 4]
    tgt_t = tgt_mat.reshape(B * TMAX, 4).T
    tgt_t = jnp.pad(tgt_t, ((0, 0), (0, NPAD - B * TMAX)))

    tgt_lengths = jnp.asarray(lens, dtype=jnp.int32)              # (B,) -> SMEM

    out = fused_set_criterion_losses(tgt_lengths, logits_bq, src_t, tgt_t,
                                     B=B, Q=Q, QPAD=QPAD, TMAX=TMAX, NPAD=NPAD,
                                     num_screws=num_screws)

    loss_ce = out[0, 0]
    card_err = out[0, 1]
    mid = out[0, 2]
    ang = out[0, 3]
    head = out[0, 4]
    tip = out[0, 5]

    # class_precision (logging only): with C == 1 the argmax is always class 0,
    # so accuracy reduces to the fraction of matched labels equal to 0.
    labels_o = jnp.concatenate([t['labels'] for t in targets])
    acc = jnp.mean((labels_o == 0).astype(jnp.float32)) * 100.0
    class_precision = 100.0 - acc

    # TODO(synk): loss_precision_recall / loss_mask_prediction / corr and the
    # aux/enc/backbone branches involve data-dependent top-k, scatter and
    # host-side control flow; not translated.
    return {
        'loss_ce': loss_ce,
        'class_precision': class_precision,
        'cardinality_error': card_err,
        'loss_screw_midpoint': mid,
        'loss_screw_angle': ang,
        'loss_screw_head': head,
        'loss_screw_tip': tip,
    }


if __name__ == "__main__":
    key = jax.random.PRNGKey(0)
    B, Q, C, T = 2, 8, 1, 3
    k1, k2, k3 = jax.random.split(key, 3)

    pred_logits = jax.random.normal(k1, (B, Q, C), jnp.float32)
    pred_screws = jax.nn.sigmoid(jax.random.normal(k2, (B, Q, 4), jnp.float32))

    tkeys = jax.random.split(k3, B)
    targets = []
    for b in range(B):
        screws = 0.1 + 0.8 * jax.random.uniform(tkeys[b], (T, 4), jnp.float32)
        labels = jnp.zeros((T,), jnp.int32)
        targets.append({'labels': labels, 'screws': screws})

    outputs = {'pred_logits': pred_logits, 'pred_screws': pred_screws}
    losses = set_criterion_forward(outputs, targets)
    losses = jax.tree_util.tree_map(jax.block_until_ready, losses)
    print("KERNEL_OK")
</pallas_src>

<mosaic_0001>
module attributes {stable_mosaic.version = 11 : i64} {
  func.func @kernel(%arg0: memref<2xi32, #tpu.memory_space<smem>>, %arg1: memref<2x128xf32, #tpu.memory_space<vmem>>, %arg2: memref<4x128xf32, #tpu.memory_space<vmem>>, %arg3: memref<4x128xf32, #tpu.memory_space<vmem>>, %arg4: memref<1x128xf32, #tpu.memory_space<vmem>>) attributes {dimension_semantics = [], scalar_prefetch = 0 : i64, scratch_operands = 0 : i64, tpu.core_type = #tpu.core_type<tc>} {
    %c0 = arith.constant 0 : index
    %c0_0 = arith.constant 0 : index
    %0 = vector.load %arg1[%c0, %c0_0] : memref<2x128xf32, #tpu.memory_space<vmem>>, vector<2x128xf32>
    %1 = tpu.iota {dimensions = array<i32: 1>} : vector<2x128xi32>
    %2 = tpu.iota {dimensions = array<i32: 0>} : vector<2x128xi32>
    %cst = arith.constant 0.000000e+00 : f32
    %3 = vector.broadcast %cst : f32 to vector<2x128xf32>
    %c0_i32 = arith.constant 0 : i32
    %4 = vector.broadcast %c0_i32 : i32 to vector<2x128xi32>
    %5 = arith.cmpi eq, %2, %4 : vector<2x128xi32>
    %c0_1 = arith.constant 0 : index
    %6 = memref.load %arg0[%c0_1] : memref<2xi32, #tpu.memory_space<smem>>
    %7 = arith.sitofp %6 : i32 to f32
    %8 = vector.broadcast %7 : f32 to vector<2x128xf32>
    %9 = arith.select %5, %8, %3 : vector<2x128xi1>, vector<2x128xf32>
    %c1_i32 = arith.constant 1 : i32
    %10 = vector.broadcast %c1_i32 : i32 to vector<2x128xi32>
    %11 = arith.cmpi eq, %2, %10 : vector<2x128xi32>
    %c1 = arith.constant 1 : index
    %12 = memref.load %arg0[%c1] : memref<2xi32, #tpu.memory_space<smem>>
    %13 = arith.sitofp %12 : i32 to f32
    %14 = vector.broadcast %13 : f32 to vector<2x128xf32>
    %15 = arith.select %11, %14, %9 : vector<2x128xi1>, vector<2x128xf32>
    %c8_i32 = arith.constant 8 : i32
    %16 = vector.broadcast %c8_i32 : i32 to vector<2x128xi32>
    %17 = arith.cmpi slt, %1, %16 : vector<2x128xi32>
    %18 = arith.extui %17 : vector<2x128xi1> to vector<2x128xi32>
    %19 = arith.sitofp %18 : vector<2x128xi32> to vector<2x128xf32>
    %20 = arith.sitofp %1 : vector<2x128xi32> to vector<2x128xf32>
    %21 = arith.cmpf olt, %20, %15 : vector<2x128xf32>
    %22 = arith.extui %21 : vector<2x128xi1> to vector<2x128xi32>
    %23 = arith.sitofp %22 : vector<2x128xi32> to vector<2x128xf32>
    %24 = arith.negf %0 : vector<2x128xf32>
    %25 = math.exp %24 : vector<2x128xf32>
    %cst_2 = arith.constant 1.000000e+00 : f32
    %26 = vector.broadcast %cst_2 : f32 to vector<2x128xf32>
    %27 = arith.addf %26, %25 : vector<2x128xf32>
    %28 = arith.divf %26, %27 : vector<2x128xf32>
    %cst_3 = arith.constant 0.000000e+00 : f32
    %29 = vector.broadcast %cst_3 : f32 to vector<2x128xf32>
    %30 = arith.maximumf %0, %29 : vector<2x128xf32>
    %31 = arith.mulf %0, %23 : vector<2x128xf32>
    %32 = arith.subf %30, %31 : vector<2x128xf32>
    %33 = math.absf %0 : vector<2x128xf32>
    %cst_4 = arith.constant 0.000000e+00 : f32
    %34 = vector.broadcast %cst_4 : f32 to vector<2x128xf32>
    %35 = arith.subf %34, %33 : vector<2x128xf32>
    %36 = math.exp %35 : vector<2x128xf32>
    %cst_5 = arith.constant 1.000000e+00 : f32
    %37 = vector.broadcast %cst_5 : f32 to vector<2x128xf32>
    %38 = arith.addf %37, %36 : vector<2x128xf32>
    %39 = math.log %38 : vector<2x128xf32>
    %40 = arith.addf %32, %39 : vector<2x128xf32>
    %41 = arith.mulf %28, %23 : vector<2x128xf32>
    %cst_6 = arith.constant 1.000000e+00 : f32
    %42 = vector.broadcast %cst_6 : f32 to vector<2x128xf32>
    %43 = arith.subf %42, %28 : vector<2x128xf32>
    %cst_7 = arith.constant 1.000000e+00 : f32
    %44 = vector.broadcast %cst_7 : f32 to vector<2x128xf32>
    %45 = arith.subf %44, %23 : vector<2x128xf32>
    %46 = arith.mulf %43, %45 : vector<2x128xf32>
    %47 = arith.addf %41, %46 : vector<2x128xf32>
    %cst_8 = arith.constant 1.000000e+00 : f32
    %48 = vector.broadcast %cst_8 : f32 to vector<2x128xf32>
    %49 = arith.subf %48, %47 : vector<2x128xf32>
    %cst_9 = arith.constant 2.500000e-01 : f32
    %50 = vector.broadcast %cst_9 : f32 to vector<2x128xf32>
    %51 = arith.mulf %50, %23 : vector<2x128xf32>
    %cst_10 = arith.constant 1.000000e+00 : f32
    %52 = vector.broadcast %cst_10 : f32 to vector<2x128xf32>
    %53 = arith.subf %52, %23 : vector<2x128xf32>
    %cst_11 = arith.constant 7.500000e-01 : f32
    %54 = vector.broadcast %cst_11 : f32 to vector<2x128xf32>
    %55 = arith.mulf %54, %53 : vector<2x128xf32>
    %56 = arith.addf %51, %55 : vector<2x128xf32>
    %57 = arith.mulf %56, %40 : vector<2x128xf32>
    %58 = arith.mulf %57, %49 : vector<2x128xf32>
    %59 = arith.mulf %58, %49 : vector<2x128xf32>
    %60 = arith.mulf %59, %19 : vector<2x128xf32>
    %61 = vector.shape_cast %60 : vector<2x128xf32> to vector<1x2x128xf32>
    %cst_12 = arith.constant dense<0.000000e+00> : vector<1xf32>
    %62 = vector.multi_reduction <add>, %61, %cst_12 [1, 2] : vector<1x2x128xf32> to vector<1xf32>
    %63 = vector.shape_cast %62 : vector<1xf32> to vector<1x1x1xf32>
    %64 = vector.extract %63[0, 0, 0] : f32 from vector<1x1x1xf32>
    %65 = vector.broadcast %64 : f32 to vector<1x1xf32>
    %cst_13 = arith.constant 0.166666672 : f32
    %66 = vector.broadcast %cst_13 : f32 to vector<1x1xf32>
    %67 = arith.mulf %65, %66 : vector<1x1xf32>
    %cst_14 = arith.constant 0.000000e+00 : f32
    %68 = vector.broadcast %cst_14 : f32 to vector<2x128xf32>
    %69 = arith.cmpf ogt, %0, %68 : vector<2x128xf32>
    %70 = arith.extui %69 : vector<2x128xi1> to vector<2x128xi32>
    %71 = arith.sitofp %70 : vector<2x128xi32> to vector<2x128xf32>
    %72 = arith.mulf %71, %19 : vector<2x128xf32>
    %cst_15 = arith.constant dense<0.000000e+00> : vector<2xf32>
    %73 = vector.multi_reduction <add>, %72, %cst_15 [1] : vector<2x128xf32> to vector<2xf32>
    %74 = vector.shape_cast %73 : vector<2xf32> to vector<2x1xf32>
    %75 = vector.extract_strided_slice %15 {offsets = [0, 0], sizes = [2, 1], strides = [1, 1]} : vector<2x128xf32> to vector<2x1xf32>
    %76 = arith.subf %74, %75 : vector<2x1xf32>
    %77 = math.absf %76 : vector<2x1xf32>
    %78 = vector.shape_cast %77 : vector<2x1xf32> to vector<1x2x1xf32>
    %cst_16 = arith.constant dense<0.000000e+00> : vector<1xf32>
    %79 = vector.multi_reduction <add>, %78, %cst_16 [1, 2] : vector<1x2x1xf32> to vector<1xf32>
    %80 = vector.shape_cast %79 : vector<1xf32> to vector<1x1x1xf32>
    %81 = vector.extract %80[0, 0, 0] : f32 from vector<1x1x1xf32>
    %82 = vector.broadcast %81 : f32 to vector<1x1xf32>
    %cst_17 = arith.constant 5.000000e-01 : f32
    %83 = vector.broadcast %cst_17 : f32 to vector<1x1xf32>
    %84 = arith.mulf %82, %83 : vector<1x1xf32>
    %c0_18 = arith.constant 0 : index
    %c0_19 = arith.constant 0 : index
    %85 = vector.load %arg2[%c0_18, %c0_19] : memref<4x128xf32, #tpu.memory_space<vmem>>, vector<4x128xf32>
    %c0_20 = arith.constant 0 : index
    %c0_21 = arith.constant 0 : index
    %86 = vector.load %arg3[%c0_20, %c0_21] : memref<4x128xf32, #tpu.memory_space<vmem>>, vector<4x128xf32>
    %87 = vector.extract_strided_slice %85 {offsets = [0, 0], sizes = [1, 128], strides = [1, 1]} : vector<4x128xf32> to vector<1x128xf32>
    %88 = vector.extract_strided_slice %85 {offsets = [1, 0], sizes = [1, 128], strides = [1, 1]} : vector<4x128xf32> to vector<1x128xf32>
    %89 = vector.extract_strided_slice %85 {offsets = [2, 0], sizes = [1, 128], strides = [1, 1]} : vector<4x128xf32> to vector<1x128xf32>
    %90 = vector.extract_strided_slice %85 {offsets = [3, 0], sizes = [1, 128], strides = [1, 1]} : vector<4x128xf32> to vector<1x128xf32>
    %91 = vector.extract_strided_slice %86 {offsets = [0, 0], sizes = [1, 128], strides = [1, 1]} : vector<4x128xf32> to vector<1x128xf32>
    %92 = vector.extract_strided_slice %86 {offsets = [1, 0], sizes = [1, 128], strides = [1, 1]} : vector<4x128xf32> to vector<1x128xf32>
    %93 = vector.extract_strided_slice %86 {offsets = [2, 0], sizes = [1, 128], strides = [1, 1]} : vector<4x128xf32> to vector<1x128xf32>
    %94 = vector.extract_strided_slice %86 {offsets = [3, 0], sizes = [1, 128], strides = [1, 1]} : vector<4x128xf32> to vector<1x128xf32>
    %95 = tpu.iota {dimensions = array<i32: 1>} : vector<1x128xi32>
    %c0_i32_22 = arith.constant 0 : i32
    %96 = vector.broadcast %c0_i32_22 : i32 to vector<1x128xi32>
    %97 = arith.cmpi slt, %95, %96 : vector<1x128xi32>
    %c0_23 = arith.constant 0 : index
    %98 = memref.load %arg0[%c0_23] : memref<2xi32, #tpu.memory_space<smem>>
    %c0_i32_24 = arith.constant 0 : i32
    %99 = vector.broadcast %c0_i32_24 : i32 to vector<1x128xi32>
    %100 = arith.cmpi sge, %95, %99 : vector<1x128xi32>
    %c0_i32_25 = arith.constant 0 : i32
    %101 = arith.addi %c0_i32_25, %98 : i32
    %102 = vector.broadcast %101 : i32 to vector<1x128xi32>
    %103 = arith.cmpi slt, %95, %102 : vector<1x128xi32>
    %104 = arith.andi %100, %103 : vector<1x128xi1>
    %105 = arith.ori %97, %104 : vector<1x128xi1>
    %c1_26 = arith.constant 1 : index
    %106 = memref.load %arg0[%c1_26] : memref<2xi32, #tpu.memory_space<smem>>
    %c3_i32 = arith.constant 3 : i32
    %107 = vector.broadcast %c3_i32 : i32 to vector<1x128xi32>
    %108 = arith.cmpi sge, %95, %107 : vector<1x128xi32>
    %c3_i32_27 = arith.constant 3 : i32
    %109 = arith.addi %c3_i32_27, %106 : i32
    %110 = vector.broadcast %109 : i32 to vector<1x128xi32>
    %111 = arith.cmpi slt, %95, %110 : vector<1x128xi32>
    %112 = arith.andi %108, %111 : vector<1x128xi1>
    %113 = arith.ori %105, %112 : vector<1x128xi1>
    %114 = arith.addf %87, %89 : vector<1x128xf32>
    %cst_28 = arith.constant 4.880000e+02 : f32
    %115 = vector.broadcast %cst_28 : f32 to vector<1x128xf32>
    %116 = arith.mulf %114, %115 : vector<1x128xf32>
    %117 = arith.addf %88, %90 : vector<1x128xf32>
    %cst_29 = arith.constant 4.880000e+02 : f32
    %118 = vector.broadcast %cst_29 : f32 to vector<1x128xf32>
    %119 = arith.mulf %117, %118 : vector<1x128xf32>
    %120 = arith.addf %91, %93 : vector<1x128xf32>
    %cst_30 = arith.constant 4.880000e+02 : f32
    %121 = vector.broadcast %cst_30 : f32 to vector<1x128xf32>
    %122 = arith.mulf %120, %121 : vector<1x128xf32>
    %123 = arith.addf %92, %94 : vector<1x128xf32>
    %cst_31 = arith.constant 4.880000e+02 : f32
    %124 = vector.broadcast %cst_31 : f32 to vector<1x128xf32>
    %125 = arith.mulf %123, %124 : vector<1x128xf32>
    %126 = arith.subf %116, %122 : vector<1x128xf32>
    %127 = math.absf %126 : vector<1x128xf32>
    %128 = arith.subf %119, %125 : vector<1x128xf32>
    %129 = math.absf %128 : vector<1x128xf32>
    %130 = arith.addf %127, %129 : vector<1x128xf32>
    %131 = arith.subf %89, %87 : vector<1x128xf32>
    %132 = arith.subf %90, %88 : vector<1x128xf32>
    %133 = arith.subf %93, %91 : vector<1x128xf32>
    %134 = arith.subf %94, %92 : vector<1x128xf32>
    %135 = arith.mulf %131, %133 : vector<1x128xf32>
    %136 = arith.mulf %132, %134 : vector<1x128xf32>
    %137 = arith.addf %135, %136 : vector<1x128xf32>
    %138 = arith.mulf %131, %131 : vector<1x128xf32>
    %139 = arith.mulf %132, %132 : vector<1x128xf32>
    %140 = arith.addf %138, %139 : vector<1x128xf32>
    %141 = math.sqrt %140 : vector<1x128xf32>
    %142 = arith.mulf %133, %133 : vector<1x128xf32>
    %143 = arith.mulf %134, %134 : vector<1x128xf32>
    %144 = arith.addf %142, %143 : vector<1x128xf32>
    %145 = math.sqrt %144 : vector<1x128xf32>
    %146 = arith.mulf %141, %145 : vector<1x128xf32>
    %cst_32 = arith.constant 9.99999993E-9 : f32
    %147 = vector.broadcast %cst_32 : f32 to vector<1x128xf32>
    %148 = arith.addf %146, %147 : vector<1x128xf32>
    %149 = arith.divf %137, %148 : vector<1x128xf32>
    %cst_33 = arith.constant -1.000000e+00 : f32
    %cst_34 = arith.constant 1.000000e+00 : f32
    %150 = vector.broadcast %cst_33 : f32 to vector<1x128xf32>
    %151 = arith.maximumf %150, %149 : vector<1x128xf32>
    %152 = vector.broadcast %cst_34 : f32 to vector<1x128xf32>
    %153 = arith.minimumf %152, %151 : vector<1x128xf32>
    %154 = math.absf %153 : vector<1x128xf32>
    %cst_35 = arith.constant -1.872930e-02 : f32
    %155 = vector.broadcast %cst_35 : f32 to vector<1x128xf32>
    %156 = arith.mulf %154, %155 : vector<1x128xf32>
    %cst_36 = arith.constant 7.426100e-02 : f32
    %157 = vector.broadcast %cst_36 : f32 to vector<1x128xf32>
    %158 = arith.addf %157, %156 : vector<1x128xf32>
    %159 = arith.mulf %154, %158 : vector<1x128xf32>
    %cst_37 = arith.constant -0.212114394 : f32
    %160 = vector.broadcast %cst_37 : f32 to vector<1x128xf32>
    %161 = arith.addf %160, %159 : vector<1x128xf32>
    %162 = arith.mulf %154, %161 : vector<1x128xf32>
    %cst_38 = arith.constant 1.57072878 : f32
    %163 = vector.broadcast %cst_38 : f32 to vector<1x128xf32>
    %164 = arith.addf %163, %162 : vector<1x128xf32>
    %cst_39 = arith.constant 1.000000e+00 : f32
    %165 = vector.broadcast %cst_39 : f32 to vector<1x128xf32>
    %166 = arith.subf %165, %154 : vector<1x128xf32>
    %cst_40 = arith.constant 0.000000e+00 : f32
    %167 = vector.broadcast %cst_40 : f32 to vector<1x128xf32>
    %168 = arith.maximumf %166, %167 : vector<1x128xf32>
    %169 = math.sqrt %168 : vector<1x128xf32>
    %170 = arith.mulf %169, %164 : vector<1x128xf32>
    %cst_41 = arith.constant 0.000000e+00 : f32
    %171 = vector.broadcast %cst_41 : f32 to vector<1x128xf32>
    %172 = arith.cmpf olt, %153, %171 : vector<1x128xf32>
    %cst_42 = arith.constant 3.14159274 : f32
    %173 = vector.broadcast %cst_42 : f32 to vector<1x128xf32>
    %174 = arith.subf %173, %170 : vector<1x128xf32>
    %175 = arith.select %172, %174, %170 : vector<1x128xi1>, vector<1x128xf32>
    %cst_43 = arith.constant 57.2957802 : f32
    %176 = vector.broadcast %cst_43 : f32 to vector<1x128xf32>
    %177 = arith.mulf %175, %176 : vector<1x128xf32>
    %178 = arith.subf %87, %91 : vector<1x128xf32>
    %cst_44 = arith.constant 9.760000e+02 : f32
    %179 = vector.broadcast %cst_44 : f32 to vector<1x128xf32>
    %180 = arith.mulf %178, %179 : vector<1x128xf32>
    %181 = arith.subf %88, %92 : vector<1x128xf32>
    %cst_45 = arith.constant 9.760000e+02 : f32
    %182 = vector.broadcast %cst_45 : f32 to vector<1x128xf32>
    %183 = arith.mulf %181, %182 : vector<1x128xf32>
    %184 = arith.subf %89, %93 : vector<1x128xf32>
    %cst_46 = arith.constant 9.760000e+02 : f32
    %185 = vector.broadcast %cst_46 : f32 to vector<1x128xf32>
    %186 = arith.mulf %184, %185 : vector<1x128xf32>
    %187 = arith.subf %90, %94 : vector<1x128xf32>
    %cst_47 = arith.constant 9.760000e+02 : f32
    %188 = vector.broadcast %cst_47 : f32 to vector<1x128xf32>
    %189 = arith.mulf %187, %188 : vector<1x128xf32>
    %190 = arith.mulf %180, %180 : vector<1x128xf32>
    %191 = arith.mulf %183, %183 : vector<1x128xf32>
    %192 = arith.addf %190, %191 : vector<1x128xf32>
    %193 = math.sqrt %192 : vector<1x128xf32>
    %194 = arith.mulf %186, %186 : vector<1x128xf32>
    %195 = arith.mulf %189, %189 : vector<1x128xf32>
    %196 = arith.addf %194, %195 : vector<1x128xf32>
    %197 = math.sqrt %196 : vector<1x128xf32>
    %cst_48 = arith.constant 1.000000e+00 : f32
    %198 = vector.broadcast %cst_48 : f32 to vector<1x128xf32>
    %199 = arith.cmpf oge, %91, %198 : vector<1x128xf32>
    %cst_49 = arith.constant 1.000000e+00 : f32
    %200 = vector.broadcast %cst_49 : f32 to vector<1x128xf32>
    %201 = arith.cmpf oge, %93, %200 : vector<1x128xf32>
    %202 = arith.andi %199, %201 : vector<1x128xi1>
    %cst_50 = arith.constant 0.000000e+00 : f32
    %203 = vector.broadcast %cst_50 : f32 to vector<1x128xf32>
    %204 = arith.cmpf ole, %91, %203 : vector<1x128xf32>
    %cst_51 = arith.constant 0.000000e+00 : f32
    %205 = vector.broadcast %cst_51 : f32 to vector<1x128xf32>
    %206 = arith.cmpf ole, %93, %205 : vector<1x128xf32>
    %207 = arith.andi %204, %206 : vector<1x128xi1>
    %208 = arith.ori %202, %207 : vector<1x128xi1>
    %cst_52 = arith.constant 1.000000e+00 : f32
    %209 = vector.broadcast %cst_52 : f32 to vector<1x128xf32>
    %210 = arith.cmpf oge, %92, %209 : vector<1x128xf32>
    %cst_53 = arith.constant 1.000000e+00 : f32
    %211 = vector.broadcast %cst_53 : f32 to vector<1x128xf32>
    %212 = arith.cmpf oge, %94, %211 : vector<1x128xf32>
    %213 = arith.andi %210, %212 : vector<1x128xi1>
    %214 = arith.ori %208, %213 : vector<1x128xi1>
    %cst_54 = arith.constant 0.000000e+00 : f32
    %215 = vector.broadcast %cst_54 : f32 to vector<1x128xf32>
    %216 = arith.cmpf ole, %92, %215 : vector<1x128xf32>
    %cst_55 = arith.constant 0.000000e+00 : f32
    %217 = vector.broadcast %cst_55 : f32 to vector<1x128xf32>
    %218 = arith.cmpf ole, %94, %217 : vector<1x128xf32>
    %219 = arith.andi %216, %218 : vector<1x128xi1>
    %220 = arith.ori %214, %219 : vector<1x128xi1>
    %cst_56 = arith.constant dense<true> : vector<1x128xi1>
    %221 = arith.xori %220, %cst_56 : vector<1x128xi1>
    %222 = arith.andi %113, %221 : vector<1x128xi1>
    %223 = arith.extui %222 : vector<1x128xi1> to vector<1x128xi32>
    %224 = arith.sitofp %223 : vector<1x128xi32> to vector<1x128xf32>
    %225 = arith.andi %113, %220 : vector<1x128xi1>
    %226 = arith.extui %225 : vector<1x128xi1> to vector<1x128xi32>
    %227 = arith.sitofp %226 : vector<1x128xi32> to vector<1x128xf32>
    %228 = vector.shape_cast %227 : vector<1x128xf32> to vector<1x1x128xf32>
    %cst_57 = arith.constant dense<0.000000e+00> : vector<1xf32>
    %229 = vector.multi_reduction <add>, %228, %cst_57 [1, 2] : vector<1x1x128xf32> to vector<1xf32>
    %230 = vector.shape_cast %229 : vector<1xf32> to vector<1x1x1xf32>
    %231 = vector.extract %230[0, 0, 0] : f32 from vector<1x1x1xf32>
    %232 = vector.broadcast %231 : f32 to vector<1x1xf32>
    %cst_58 = arith.constant 6.000000e+00 : f32
    %233 = vector.broadcast %cst_58 : f32 to vector<1x1xf32>
    %234 = arith.subf %233, %232 : vector<1x1xf32>
    %cst_59 = arith.constant 1.000000e+00 : f32
    %235 = vector.broadcast %cst_59 : f32 to vector<1x1xf32>
    %236 = arith.maximumf %234, %235 : vector<1x1xf32>
    %237 = tpu.reciprocal %236 {approx = true} : vector<1x1xf32> -> vector<1x1xf32>
    %238 = arith.mulf %130, %224 : vector<1x128xf32>
    %239 = vector.shape_cast %238 : vector<1x128xf32> to vector<1x1x128xf32>
    %cst_60 = arith.constant dense<0.000000e+00> : vector<1xf32>
    %240 = vector.multi_reduction <add>, %239, %cst_60 [1, 2] : vector<1x1x128xf32> to vector<1xf32>
    %241 = vector.shape_cast %240 : vector<1xf32> to vector<1x1x1xf32>
    %242 = vector.extract %241[0, 0, 0] : f32 from vector<1x1x1xf32>
    %243 = vector.broadcast %242 : f32 to vector<1x1xf32>
    %244 = arith.mulf %243, %237 : vector<1x1xf32>
    %245 = arith.mulf %177, %224 : vector<1x128xf32>
    %246 = vector.shape_cast %245 : vector<1x128xf32> to vector<1x1x128xf32>
    %cst_61 = arith.constant dense<0.000000e+00> : vector<1xf32>
    %247 = vector.multi_reduction <add>, %246, %cst_61 [1, 2] : vector<1x1x128xf32> to vector<1xf32>
    %248 = vector.shape_cast %247 : vector<1xf32> to vector<1x1x1xf32>
    %249 = vector.extract %248[0, 0, 0] : f32 from vector<1x1x1xf32>
    %250 = vector.broadcast %249 : f32 to vector<1x1xf32>
    %251 = arith.mulf %250, %237 : vector<1x1xf32>
    %252 = arith.mulf %193, %224 : vector<1x128xf32>
    %253 = vector.shape_cast %252 : vector<1x128xf32> to vector<1x1x128xf32>
    %cst_62 = arith.constant dense<0.000000e+00> : vector<1xf32>
    %254 = vector.multi_reduction <add>, %253, %cst_62 [1, 2] : vector<1x1x128xf32> to vector<1xf32>
    %255 = vector.shape_cast %254 : vector<1xf32> to vector<1x1x1xf32>
    %256 = vector.extract %255[0, 0, 0] : f32 from vector<1x1x1xf32>
    %257 = vector.broadcast %256 : f32 to vector<1x1xf32>
    %258 = arith.mulf %257, %237 : vector<1x1xf32>
    %259 = arith.mulf %197, %224 : vector<1x128xf32>
    %260 = vector.shape_cast %259 : vector<1x128xf32> to vector<1x1x128xf32>
    %cst_63 = arith.constant dense<0.000000e+00> : vector<1xf32>
    %261 = vector.multi_reduction <add>, %260, %cst_63 [1, 2] : vector<1x1x128xf32> to vector<1xf32>
    %262 = vector.shape_cast %261 : vector<1xf32> to vector<1x1x1xf32>
    %263 = vector.extract %262[0, 0, 0] : f32 from vector<1x1x1xf32>
    %264 = vector.broadcast %263 : f32 to vector<1x1xf32>
    %265 = arith.mulf %264, %237 : vector<1x1xf32>
    %266 = tpu.iota {dimensions = array<i32: 1>} : vector<1x128xi32>
    %cst_64 = arith.constant 0.000000e+00 : f32
    %267 = vector.broadcast %cst_64 : f32 to vector<1x128xf32>
    %c0_i32_65 = arith.constant 0 : i32
    %268 = vector.broadcast %c0_i32_65 : i32 to vector<1x128xi32>
    %269 = arith.cmpi eq, %266, %268 : vector<1x128xi32>
    %270 = vector.shape_cast %67 : vector<1x1xf32> to vector<1x1xf32>
    %271 = vector.broadcast %270 : vector<1x1xf32> to vector<1x128xf32>
    %272 = arith.select %269, %271, %267 : vector<1x128xi1>, vector<1x128xf32>
    %c1_i32_66 = arith.constant 1 : i32
    %273 = vector.broadcast %c1_i32_66 : i32 to vector<1x128xi32>
    %274 = arith.cmpi eq, %266, %273 : vector<1x128xi32>
    %275 = vector.shape_cast %84 : vector<1x1xf32> to vector<1x1xf32>
    %276 = vector.broadcast %275 : vector<1x1xf32> to vector<1x128xf32>
    %277 = arith.select %274, %276, %267 : vector<1x128xi1>, vector<1x128xf32>
    %278 = arith.addf %272, %277 : vector<1x128xf32>
    %c2_i32 = arith.constant 2 : i32
    %279 = vector.broadcast %c2_i32 : i32 to vector<1x128xi32>
    %280 = arith.cmpi eq, %266, %279 : vector<1x128xi32>
    %281 = vector.shape_cast %244 : vector<1x1xf32> to vector<1x1xf32>
    %282 = vector.broadcast %281 : vector<1x1xf32> to vector<1x128xf32>
    %283 = arith.select %280, %282, %267 : vector<1x128xi1>, vector<1x128xf32>
    %284 = arith.addf %278, %283 : vector<1x128xf32>
    %c3_i32_67 = arith.constant 3 : i32
    %285 = vector.broadcast %c3_i32_67 : i32 to vector<1x128xi32>
    %286 = arith.cmpi eq, %266, %285 : vector<1x128xi32>
    %287 = vector.shape_cast %251 : vector<1x1xf32> to vector<1x1xf32>
    %288 = vector.broadcast %287 : vector<1x1xf32> to vector<1x128xf32>
    %289 = arith.select %286, %288, %267 : vector<1x128xi1>, vector<1x128xf32>
    %290 = arith.addf %284, %289 : vector<1x128xf32>
    %c4_i32 = arith.constant 4 : i32
    %291 = vector.broadcast %c4_i32 : i32 to vector<1x128xi32>
    %292 = arith.cmpi eq, %266, %291 : vector<1x128xi32>
    %293 = vector.shape_cast %258 : vector<1x1xf32> to vector<1x1xf32>
    %294 = vector.broadcast %293 : vector<1x1xf32> to vector<1x128xf32>
    %295 = arith.select %292, %294, %267 : vector<1x128xi1>, vector<1x128xf32>
    %296 = arith.addf %290, %295 : vector<1x128xf32>
    %c5_i32 = arith.constant 5 : i32
    %297 = vector.broadcast %c5_i32 : i32 to vector<1x128xi32>
    %298 = arith.cmpi eq, %266, %297 : vector<1x128xi32>
    %299 = vector.shape_cast %265 : vector<1x1xf32> to vector<1x1xf32>
    %300 = vector.broadcast %299 : vector<1x1xf32> to vector<1x128xf32>
    %301 = arith.select %298, %300, %267 : vector<1x128xi1>, vector<1x128xf32>
    %302 = arith.addf %296, %301 : vector<1x128xf32>
    %c0_68 = arith.constant 0 : index
    %c0_69 = arith.constant 0 : index
    %303 = vector.load %arg4[%c0_68, %c0_69] : memref<1x128xf32, #tpu.memory_space<vmem>>, vector<1x128xf32>
    tpu.vector_store %arg4[%c0_68, %c0_69], %302 {strides = array<i32>} : memref<1x128xf32, #tpu.memory_space<vmem>>, vector<1x128xf32>,
    return
  }
}

</mosaic_0001>

<bundles_post_ra>
// kernel: tpu_custom_call.1
= control target key start
LH: loop header
LB: loop body
LE: loop exit
PB: predicated region body
PF: predicated region fallthrough
CT: control target
= control target key end

     0   :  { %9 = vsyncpa [#allocation5], 0  ;;  %s698_s0 = inlined_call_operand.hbm [shape: s32[2], index: 0, kind: input, shape index: {}]   ;;  %s699_s1 = inlined_call_operand.hbm [shape: f32[2,128], index: 1, kind: input, shape index: {}]   ;;  %s700_s2 = inlined_call_operand.hbm [shape: f32[4,128], index: 2, kind: input, shape index: {}]   ;;  %s701_s3 = inlined_call_operand.vmem [shape: f32[4,128], index: 3, kind: input, shape index: {}]   ;;  %s702_s4 = inlined_call_operand.hbm [shape: f32[1,128], index: 4, kind: output, shape index: {}]  }
   0x1   :  { %10 = vsyncpa [#allocation3], 0 }
   0x2   :  { %11 = vsyncpa [#allocation8], 0 }
   0x3   :  { %12 = vsyncpa [#allocation4], 0  ;;  %s508_s15 = smov [#allocation2]   ;;  %s509_s18 = smov [#allocation6]  }
   0x4   :  { %20 = dma.hbm_to_smem %s698_s0, 16, %s508_s15, [#allocation5]  }
   0x5   :  { %s27_s19 = sshll.u32 %s509_s18, 4  ;;  %s510_s20 = smov [#allocation7]   ;;  %s28_s19 = int_to_ptr.vmem [resolvable:$true] %s27_s19 }
   0x6   :  { %s37_s21 = sshll.u32 %s510_s20, 4  ;;  %s448_s22 = scalar_lea.vmem %s28_s19, 32  ;;  %s38_s21 = int_to_ptr.vmem [resolvable:$true] %s37_s21 }
   0x7   :  { %p449_p0 = scmp.ne.s32.totalorder %s28_s19, %s448_s22  ;;  %p453_p1 = scmp.lt.s32.totalorder %s28_s19, %s28_s19 }
   0x8   :  { %p454_p2 = scmp.lt.s32.totalorder %s448_s22, %s448_s22 }
   0xa   :  { %p455_p3 = por %p454_p2, %p453_p1 }
   0xc   :  { %p456_p4 = pnand %p455_p3, %p449_p0 }
   0xe   :  { %459 = shalt.err (!%p456_p4)
}
   0xf   :  { %30 = dma.hbm_to_vmem [thread:$0]  %s699_s1, 32, %s28_s19, [#allocation3]  }
  0x10   :  { %s468_s25 = scalar_lea.vmem %s38_s21, 64  ;;  %p473_p6 = scmp.lt.s32.totalorder %s38_s21, %s38_s21 }
  0x11   :  { %p469_p5 = scmp.ne.s32.totalorder %s38_s21, %s468_s25  ;;  %p474_p7 = scmp.lt.s32.totalorder %s468_s25, %s468_s25 }
  0x13   :  { %p475_p8 = por %p474_p7, %p473_p6 }
  0x15   :  { %p476_p9 = pnand %p475_p8, %p469_p5 }
  0x17   :  { %479 = shalt.err (!%p476_p9)
}
  0x18   :  { %40 = dma.hbm_to_vmem [thread:$0]  %s700_s2, 64, %s38_s21, [#allocation8]  }
  0x19   :  { %500 = dma.done.wait [#allocation5], 16  }
  0x1a   :  { %501 = vsyncadd [#allocation5], 4294967280 }
  0x1b   :  { %502 = dma.done.wait [#allocation3], 32  }
  0x1c   :  { %503 = vsyncadd [#allocation3], 4294967264 }
  0x1d   :  { %504 = dma.done.wait [#allocation8], 64  }
  0x1e   :  { %505 = vsyncadd [#allocation8], 4294967232 }
  0x1f   :  { %52 = sfence }
  0x20   :  { %v549_v0 = vld [vmem:[#allocation6] sm:$0x3]  ;;  %v54_v1 = vlaneseq  ;;  %s551_s1 = sld [smem:[#allocation2]]  ;;  %v511_v5 = vmov 0.0   ;;  %vm105_vm2 = vcmask 1041408   ;;  %v512_v19 = vmov 0  }
  0x21   :  { %vm118_vm0 = vcmp.gt.f32.partialorder %v549_v0, 0.0  ;;  %v386_v2 = vmul.f32 -1.442695, %v549_v0  ;;  %v84_v3 = vand.u32 2147483647, %v549_v0  ;;  %s558_s2 = sld [smem:[#allocation2 + $0x1]] }
  0x22   :  { %v556_v4 = vand.u32 127, %v54_v1  ;;  %v387_v6 = vsel %vm118_vm0, 1.0, %v511_v5  ;;  %v57_v10 = vshrl.u32 %v54_v1, 7  ;;  %v141_v15 = vld [vmem:[%s701_s3] sm:$0xf]  ;;  %v81_v1 = vmax.f32 %v549_v0, 0.0 }
  0x23   :  { %412 = vpow2.f32 %v386_v2  ;;  %v85_v7 = vsub.f32 0.0, %v84_v3  ;;  %v140_v16 = vld [vmem:[#allocation7] sm:$0xf]  ;;  %vm246_vm5 = vcmp.ge.f32.partialorder %v141_v15, 1.0  ;;  %vm251_vm6 = vcmp.le.f32.partialorder %v141_v15, 0.0  ;;  %s514_s12 = smov [#allocation9]  }
  0x24   :  { %vm68_vm1 = vcmp.lt.s32.totalorder %v556_v4, 8  ;;  %vm58_vm3 = vcmp.eq.s32.totalorder %v57_v10, 0  ;;  %vm63_vm4 = vcmp.eq.s32.totalorder %v57_v10, 1  ;;  %v232_v18 = vsub.f32 %v140_v16, %v141_v15  ;;  %s372_s13 = sshll.u32 %s514_s12, 4  ;;  %s373_s13 = int_to_ptr.vmem [resolvable:$true] %s372_s13 }
  0x25   :  { %v563_v8 = vsel %vm68_vm1, 1.0, %v511_v5  ;;  %v86_v9 = vmul.f32 1.442695, %v85_v7  ;;  %v247_v20 = vsel %vm246_vm5, 1, %v512_v19  ;;  %v71_v21 = vcvt.s32.f32 %v556_v4  ;;  %s480_s14 = scalar_lea.vmem %s373_s13, 16  ;;  %s484_s15 = scalar_lea.vmem %s373_s13, 32 }
  0x26   :  { %v121_v11 = vmul.f32 %v387_v6, %v563_v8  ;;  %s60_s27 = scvt.s32.f32 %s551_s1  ;;  %v248_v22 = vrot.slane %v247_v20, 2  ;;  %v233_v23 = vmul.f32 976.0, %v232_v18  ;;  %v252_v26 = vsel %vm251_vm6, 1, %v512_v19  ;;  %p481_p10 = scmp.ne.s32.totalorder %s373_s13, %s480_s14 }
  0x27   :  { %414 = vpow2.f32 %v86_v9  ;;  %s65_s28 = scvt.s32.f32 %s558_s2  ;;  %v170_v27 = vrot.slane %v140_v16, 6  ;;  %v173_v28 = vrot.slane %v141_v15, 6  ;;  %v253_v30 = vrot.slane %v252_v26, 2  ;;  %s149_s3 = sadd.s32 3, %s558_s2 }
  0x28   :  { %v122_v12 = vsel %vm105_vm2, %v121_v11, 0.0  ;;  %v61_v13 = vstv %s60_s27  ;;  %vm249_vm7 = vcmp.ne.s32.totalorder %v248_v22, 0  ;;  %v234_v31 = vmul.f32 %v233_v23, %v233_v23  ;;  %p485_p11 = scmp.lt.s32.totalorder %s373_s13, %s373_s13  ;;  %p486_p12 = scmp.lt.s32.totalorder %s484_s15, %s480_s14 }
  0x29   :  { %123 = vadd.xlane.f32.xlu0 %v122_v12  ;;  %v62_v14 = vsel %vm58_vm3, %v61_v13, 0.0  ;;  %v66_v17 = vstv %s65_s28  ;;  %vm578_vm8 = vmand %vm246_vm5, %vm249_vm7  ;;  %vm254_vm9 = vcmp.ne.s32.totalorder %v253_v30, 0  ;;  %v595_v38 = vsub.f32 %v140_v16, %v170_v27 }
  0x2a   :  { %v574_v25 = vsel %vm63_vm4, %v66_v17, %v62_v14  ;;  %v257_v33 = vsel %vm578_vm8, 1, %v512_v19  ;;  %vm591_vm11 = vmand %vm251_vm6, %vm254_vm9  ;;  %v597_v39 = vsub.f32 %v141_v15, %v173_v28  ;;  %v150_v41 = vstv %s149_s3  ;;  %p487_p13 = por %p486_p12, %p485_p11 }
  0x2b   :  { %vm585_vm10 = vcmp.lt.f32.partialorder %v71_v21, %v574_v25  ;;  %v258_v37 = vrot.slane %v257_v33, 1  ;;  %v261_v42 = vsel %vm591_vm11, 1, %v512_v19  ;;  %v236_v43 = vrot.slane %v234_v31, 1  ;;  %vm256_vm14 = vmor %vm578_vm8, %vm591_vm11 }
  0x2c   :  { %v144_v44 = vstv %s551_s1  ;;  %vm148_vm12 = vcmp.ge.s32.totalorder %v556_v4, 3  ;;  %vm151_vm13 = vcmp.lt.s32.totalorder %v556_v4, %v150_v41  ;;  %v262_v47 = vrot.slane %v261_v42, 1  ;;  %p488_p0 = pnand %p487_p13, %p481_p10 }
  0x2d   :  { %vm259_vm15 = vcmp.ne.s32.totalorder %v258_v37, 0  ;;  %vm609_vm0 = vcmp.lt.s32.totalorder %v556_v4, %v144_v44  ;;  %vm613_vm1 = vmand %vm148_vm12, %vm151_vm13  ;;  %v155_v48 = vrot.slane %v140_v16, 2  ;;  %v160_v49 = vrot.slane %v141_v15, 2 }
  0x2e   :  { %vm153_vm3 = vmor %vm609_vm0, %vm613_vm1  ;;  %vm625_vm5 = vcmp.ne.s32.totalorder %v262_v47, 0  ;;  %v181_v53 = vmul.f32 %v595_v38, %v595_v38  ;;  %v385_v54 = vsel %vm585_vm10, 1.0, %v511_v5  ;;  %v193_v56 = vmul.f32 %v597_v39, %v597_v39 }
  0x2f   :  { %vm621_vm4 = vmor %vm256_vm14, %vm259_vm15  ;;  %v157_v52 = vadd.f32 %v155_v48, %v140_v16  ;;  %v162_v55 = vadd.f32 %v160_v49, %v141_v15  ;;  %v238_v57 = vadd.f32 %v236_v43, %v234_v31  ;;  %v94_v60 = vsub.f32 1.0, %v385_v54 }
  0x30   :  { %v413_v24 = vpop.eup %412  ;;  %vm264_vm6 = vmor %vm621_vm4, %vm625_vm5  ;;  %v183_v61 = vrot.slane %v181_v53, 1  ;;  %v195_v63 = vrot.slane %v193_v56, 1  ;;  %v82_v2 = vmul.f32 %v385_v54, %v549_v0  ;;  %v98_v7 = vmul.f32 0.25, %v385_v54 }
  0x31   :  { %v78_v29 = vadd.f32 1.0, %v413_v24  ;;  %v158_v58 = vmul.f32 488.0, %v157_v52  ;;  %v163_v59 = vmul.f32 488.0, %v162_v55  ;;  %vm269_vm7 = vmand %vm153_vm3, %vm264_vm6  ;;  %v99_v9 = vmul.f32 0.75, %v94_v60 }
  0x32   :  { %v651_v62 = vsel %vm269_vm7, 1.0, %v511_v5  ;;  %v185_v12 = vadd.f32 %v183_v61, %v181_v53  ;;  %v197_v13 = vadd.f32 %v195_v63, %v193_v56  ;;  %v83_v14 = vsub.f32 %v81_v1, %v82_v2 }
  0x33   :  { %416 = vrcp.f32 %v78_v29  ;;  %v164_v3 = vsub.f32 %v158_v58, %v163_v59  ;;  %vm513_vm8 = vmmov 1   ;;  %v100_v0 = vadd.f32 %v99_v9, %v98_v7 }
  0x34   :  { %v415_v34 = vpop.eup %414  ;;  %vm265_vm9 = vmxor %vm264_vm6, %vm513_vm8  ;;  %vm241_vm11 = vcmp.eq.f32.partialorder %v238_v57, inf  ;;  %v244_v27 = vand.u32 2147483648, %v238_v57  ;;  %vm243_vm12 = vcmp.eq.f32.partialorder %v238_v57, 0.0  ;;  %vm272_vm13 = vcmask 1040384  }
  0x35   :  { %v88_v40 = vadd.f32 1.0, %v415_v34  ;;  %v165_v16 = vand.u32 2147483647, %v164_v3  ;;  %vm266_vm10 = vmand %vm153_vm3, %vm265_vm9  ;;  %vm188_vm14 = vcmp.eq.f32.partialorder %v185_v12, inf  ;;  %vm200_vm15 = vcmp.eq.f32.partialorder %v197_v13, inf }
  0x36   :  { %v666_v26 = vsel %vm266_vm10, 1.0, %v511_v5  ;;  %v203_v47 = vand.u32 2147483648, %v197_v13  ;;  %vm190_vm0 = vcmp.eq.f32.partialorder %v185_v12, 0.0  ;;  %vm127_vm5 = vcmask 1024  }
  0x37   :  { %418 = vlog2.f32 %v88_v40  ;;  %v167_v22 = vrot.slane %v165_v16, 1  ;;  %v301_v31 = vrot.slane %v666_v26, 6  ;;  %vm350_vm6 = vcmp.eq.s32.totalorder %v556_v4, 1 }
  0x38   :  { %420 = vrsqrt.f32 %v238_v57  ;;  %vm348_vm7 = vcmp.eq.s32.totalorder %v556_v4, 0  ;;  %vm353_vm8 = vcmp.eq.s32.totalorder %v556_v4, 2  ;;  %vm356_vm9 = vcmp.eq.s32.totalorder %v556_v4, 3 }
  0x39   :  { %422 = vrsqrt.f32 %v185_v12  ;;  %v169_v30 = vadd.f32 %v167_v22, %v165_v16  ;;  %vm359_vm10 = vcmp.eq.s32.totalorder %v556_v4, 4 }
  0x3a   :  { %424 = vrsqrt.f32 %v197_v13 }
  0x3b   :  { %v287_v5 = vmul.f32 %v666_v26, %v169_v30 }
  0x3d   :  { %v288_v42 = vsel %vm272_vm13, %v287_v5, 0.0 }
  0x40   :  { %v417_v6 = vpop.eup %416 }
  0x41   :  { %v92_v10 = vmul.f32 %v417_v6, %v385_v54  ;;  %v93_v11 = vsub.f32 1.0, %v417_v6  ;;  %v176_v54 = vmul.f32 %v597_v39, %v595_v38 }
  0x43   :  { %v95_v15 = vmul.f32 %v94_v60, %v93_v11  ;;  %v178_v55 = vrot.slane %v176_v54, 1 }
  0x44   :  { %v419_v17 = vpop.eup %418 }
  0x45   :  { %v90_v18 = vmul.f32 0.6931472, %v419_v17  ;;  %v96_v19 = vadd.f32 %v95_v15, %v92_v10  ;;  %v421_v23 = vpop.eup %420  ;;  %v180_v56 = vadd.f32 %v178_v55, %v176_v54 }
  0x46   :  { %v240_v28 = vmul.f32 %v421_v23, %v238_v57  ;;  %v423_v40 = vpop.eup %422 }
  0x47   :  { %v91_v20 = vadd.f32 %v90_v18, %v83_v14  ;;  %v97_v21 = vsub.f32 1.0, %v96_v19  ;;  %v425_v41 = vpop.eup %424  ;;  %v187_v44 = vmul.f32 %v423_v40, %v185_v12 }
  0x48   :  { %v242_v32 = vsel %vm241_vm11, %v238_v57, %v240_v28  ;;  %v199_v45 = vmul.f32 %v425_v41, %v197_v13  ;;  %vm362_vm11 = vcmp.eq.s32.totalorder %v556_v4, 5 }
  0x49   :  { %v101_v24 = vmul.f32 %v100_v0, %v91_v20  ;;  %v245_v34 = vsel %vm243_vm12, %v244_v27, %v242_v32  ;;  %v189_v48 = vsel %vm188_vm14, %v185_v12, %v187_v44 }
  0x4a   :  { %v671_v35 = vmul.f32 %v301_v31, %v245_v34  ;;  %v319_v43 = vmul.f32 %v666_v26, %v245_v34  ;;  %v201_v49 = vsel %vm200_vm15, %v197_v13, %v199_v45 }
  0x4b   :  { %v102_v29 = vmul.f32 %v101_v24, %v97_v21 }
  0x4c   :  { %v320_v46 = vsel %vm272_vm13, %v319_v43, 0.0  ;;  %v334_v24 = vrot.slane %v671_v35, 2 }
  0x4d   :  { %v103_v33 = vmul.f32 %v102_v29, %v97_v21  ;;  %v273_v21 = vsel %vm272_vm13, %v651_v62, 0.0 }
  0x4e   :  { %v336_v27 = vsel %vm272_vm13, %v334_v24, 0.0 }
  0x4f   :  { %v104_v36 = vmul.f32 %v563_v8, %v103_v33  ;;  %v191_v8 = vand.u32 2147483648, %v185_v12 }
  0x51   :  { %v106_v37 = vsel %vm105_vm2, %v104_v36, 0.0  ;;  %vm202_vm2 = vcmp.eq.f32.partialorder %v197_v13, 0.0  ;;  %v192_v50 = vsel %vm190_vm0, %v191_v8, %v189_v48 }
  0x52   :  { %107 = vadd.xlane.f32.xlu0 %v106_v37  ;;  %v204_v51 = vsel %vm202_vm2, %v203_v47, %v201_v49 }
  0x53   :  { %v205_v52 = vmul.f32 %v204_v51, %v192_v50 }
  0x55   :  { %v206_v53 = vadd.f32 1e-08, %v205_v52 }
  0x56   :  { %289 = vadd.xlane.f32.xlu0 %v288_v42 }
  0x57   :  { %426 = vrcp.f32 %v206_v53 }
  0x5a   :  { %321 = vadd.xlane.f32.xlu0 %v320_v46 }
  0x64   :  { %v427_v57 = vpop.eup %426 }
  0x65   :  { %v208_v58 = vmul.f32 %v427_v57, %v180_v56 }
  0x67   :  { %v388_v59 = vclamps-f32 %v208_v58, 1.0 }
  0x69   :  { %v211_v60 = vand.u32 2147483647, %v388_v59  ;;  %vm228_vm4 = vcmp.lt.f32.partialorder %v388_v59, 0.0 }
  0x6b   :  { %v218_v61 = vsub.f32 1.0, %v211_v60  ;;  %v212_v1 = vmul.f32 -0.0187293, %v211_v60 }
  0x6d   :  { %v219_v63 = vmax.f32 %v218_v61, 0.0  ;;  %v213_v2 = vadd.f32 0.074261, %v212_v1 }
  0x6f   :  { %428 = vrsqrt.f32 %v219_v63  ;;  %v214_v3 = vmul.f32 %v213_v2, %v211_v60  ;;  %vm222_vm1 = vcmp.eq.f32.partialorder %v219_v63, inf  ;;  %v225_v11 = vand.u32 2147483648, %v219_v63 }
  0x70   :  { %vm224_vm3 = vcmp.eq.f32.partialorder %v219_v63, 0.0 }
  0x71   :  { %v215_v7 = vadd.f32 -0.2121144, %v214_v3 }
  0x73   :  { %v216_v10 = vmul.f32 %v215_v7, %v211_v60 }
  0x75   :  { %v217_v38 = vadd.f32 1.5707288, %v216_v10 }
  0x7c   :  { %v429_v6 = vpop.eup %428 }
  0x7d   :  { %v221_v9 = vmul.f32 %v429_v6, %v219_v63 }
  0x7f   :  { %v223_v12 = vsel %vm222_vm1, %v219_v63, %v221_v9 }
  0x80   :  { %v226_v39 = vsel %vm224_vm3, %v225_v11, %v223_v12 }
  0x81   :  { %v227_v13 = vmul.f32 %v226_v39, %v217_v38 }
  0x83   :  { %v229_v14 = vsub.f32 3.1415927, %v227_v13 }
  0x85   :  { %v230_v15 = vsel %vm228_vm4, %v229_v14, %v227_v13 }
  0x86   :  { %v231_v16 = vmul.f32 57.29578, %v230_v15 }
  0x88   :  { %v303_v19 = vmul.f32 %v301_v31, %v231_v16 }
  0x8a   :  { %v305_v22 = vrot.slane %v303_v19, 2 }
  0x8c   :  { %v307_v23 = vsel %vm272_vm13, %v305_v22, 0.0 }
  0xb2   :  { %v124_v17 = vpop.xlane.xlu0 %123 }
  0xb3   :  { %v125_v0 = vsub.f32 %v124_v17, %v574_v25 }
  0xb5   :  { %v126_v18 = vand.u32 2147483647, %v125_v0 }
  0xb7   :  { %v128_v20 = vsel %vm127_vm5, %v126_v18, 0.0 }
  0xb8   :  { %129 = vadd.xlane.f32.xlu1 %v128_v20 }
  0xbc   :  { %274 = vadd.xlane.f32.xlu1 %v273_v21 }
  0xc0   :  { %308 = vadd.xlane.f32.xlu1 %v307_v23 }
  0xc4   :  { %337 = vadd.xlane.f32.xlu1 %v336_v27 }
  0xdb   :  { %v108_v25 = vpop.xlane.xlu0 %107 }
  0xdc   :  { %v109_v28 = vrot.slane %v108_v25, 4 }
  0xde   :  { %v110_v29 = vadd.f32 %v109_v28, %v108_v25 }
  0xdf   :  { %v290_v33 = vpop.xlane.xlu0 %289 }
  0xe0   :  { %v111_v26 = vrot.slane %v110_v29, 2  ;;  %v291_v62 = vrot.slane %v290_v33, 4 }
  0xe2   :  { %v112_v30 = vadd.f32 %v111_v26, %v110_v29  ;;  %v292_v36 = vadd.f32 %v291_v62, %v290_v33 }
  0xe3   :  { %v322_v34 = vpop.xlane.xlu0 %321 }
  0xe4   :  { %v113_v31 = vrot.slane %v112_v30, 1  ;;  %v323_v5 = vrot.slane %v322_v34, 4  ;;  %v293_v35 = vrot.slane %v292_v36, 2 }
  0xe6   :  { %v114_v32 = vadd.f32 %v113_v31, %v112_v30  ;;  %v324_v41 = vadd.f32 %v323_v5, %v322_v34  ;;  %v294_v8 = vadd.f32 %v293_v35, %v292_v36 }
  0xe8   :  { %391 = vpush %v114_v32  ;;  %v325_v46 = vrot.slane %v324_v41, 2  ;;  %v295_v54 = vrot.slane %v294_v8, 1 }
  0xea   :  { %v326_v53 = vadd.f32 %v325_v46, %v324_v41  ;;  %v296_v63 = vadd.f32 %v295_v54, %v294_v8 }
  0xec   :  { %v327_v1 = vrot.slane %v326_v53, 1 }
  0xee   :  { %v328_v10 = vadd.f32 %v327_v1, %v326_v53 }
 0x119   :  { %s392_s5 = spop %391 }
 0x11a   :  { %v116_v17 = vstv %s392_s5 }
 0x11b   :  { %v117_v18 = vmul.f32 0.16666667, %v116_v17 }
 0x11d   :  { %v349_v23 = vsel %vm348_vm7, %v117_v18, 0.0 }
 0x141   :  { %v130_v37 = vpop.xlane.xlu1 %129 }
 0x142   :  { %v131_v40 = vrot.slane %v130_v37, 4 }
 0x144   :  { %v132_v42 = vadd.f32 %v131_v40, %v130_v37 }
 0x145   :  { %v275_v43 = vpop.xlane.xlu1 %274 }
 0x146   :  { %v133_v44 = vrot.slane %v132_v42, 2  ;;  %v276_v45 = vrot.slane %v275_v43, 4 }
 0x148   :  { %v277_v47 = vadd.f32 %v276_v45, %v275_v43  ;;  %v134_v48 = vadd.f32 %v133_v44, %v132_v42 }
 0x149   :  { %v309_v49 = vpop.xlane.xlu1 %308 }
 0x14a   :  { %v278_v50 = vrot.slane %v277_v47, 2  ;;  %v135_v51 = vrot.slane %v134_v48, 1  ;;  %v310_v52 = vrot.slane %v309_v49, 4 }
 0x14c   :  { %v136_v55 = vadd.f32 %v135_v51, %v134_v48  ;;  %v279_v56 = vadd.f32 %v278_v50, %v277_v47  ;;  %v311_v57 = vadd.f32 %v310_v52, %v309_v49 }
 0x14d   :  { %v338_v58 = vpop.xlane.xlu1 %337 }
 0x14e   :  { %393 = vpush %v136_v55  ;;  %v280_v59 = vrot.slane %v279_v56, 1  ;;  %v312_v60 = vrot.slane %v311_v57, 2  ;;  %v339_v61 = vrot.slane %v338_v58, 4 }
 0x150   :  { %v281_v2 = vadd.f32 %v280_v59, %v279_v56  ;;  %v340_v3 = vadd.f32 %v339_v61, %v338_v58  ;;  %v313_v6 = vadd.f32 %v312_v60, %v311_v57 }
 0x152   :  { %395 = vpush %v281_v2  ;;  %v341_v7 = vrot.slane %v340_v3, 2  ;;  %v314_v9 = vrot.slane %v313_v6, 1 }
 0x153   :  { %397 = vpush %v296_v63 }
 0x154   :  { %v342_v11 = vadd.f32 %v341_v7, %v340_v3  ;;  %v315_v12 = vadd.f32 %v314_v9, %v313_v6 }
 0x156   :  { %399 = vpush %v315_v12  ;;  %v343_v38 = vrot.slane %v342_v11, 1 }
 0x157   :  { %401 = vpush %v328_v10 }
 0x158   :  { %v344_v39 = vadd.f32 %v343_v38, %v342_v11 }
 0x15a   :  { %403 = vpush %v344_v39 }
 0x17f   :  { %s394_s6 = spop %393 }
 0x180   :  { %v138_v16 = vstv %s394_s6 }
 0x181   :  { %v139_v0 = vmul.f32 0.5, %v138_v16 }
 0x183   :  { %s396_s7 = spop %395  ;;  %v351_v19 = vsel %vm350_vm6, %v139_v0, 0.0 }
 0x184   :  { %v283_v13 = vstv %s396_s7  ;;  %s398_s8 = spop %397  ;;  %v352_v25 = vadd.f32 %v351_v19, %v349_v23 }
 0x185   :  { %v284_v14 = vsub.f32 6.0, %v283_v13  ;;  %v298_v21 = vstv %s398_s8 }
 0x187   :  { %v285_v15 = vmax.f32 %v284_v14, 1.0  ;;  %s400_s9 = spop %399 }
 0x188   :  { %s402_s10 = spop %401  ;;  %v317_v22 = vstv %s400_s9 }
 0x189   :  { %430 = vrcp.f32 %v285_v15  ;;  %v330_v28 = vstv %s402_s10 }
 0x18b   :  { %s404_s11 = spop %403 }
 0x18c   :  { %v346_v29 = vstv %s404_s11 }
 0x196   :  { %v431_v20 = vpop.eup %430 }
 0x197   :  { %v299_v24 = vmul.f32 %v431_v20, %v298_v21  ;;  %v318_v27 = vmul.f32 %v431_v20, %v317_v22  ;;  %v331_v30 = vmul.f32 %v431_v20, %v330_v28  ;;  %v347_v33 = vmul.f32 %v431_v20, %v346_v29 }
 0x199   :  { %v354_v26 = vsel %vm353_vm8, %v299_v24, 0.0  ;;  %v357_v32 = vsel %vm356_vm9, %v318_v27, 0.0  ;;  %v360_v34 = vsel %vm359_vm10, %v331_v30, 0.0  ;;  %v363_v5 = vsel %vm362_vm11, %v347_v33, 0.0 }
 0x19a   :  { %v355_v31 = vadd.f32 %v354_v26, %v352_v25 }
 0x19c   :  { %v358_v62 = vadd.f32 %v357_v32, %v355_v31 }
 0x19e   :  { %v361_v36 = vadd.f32 %v360_v34, %v358_v62 }
 0x1a0   :  { %v364_v37 = vadd.f32 %v363_v5, %v361_v36 }
 0x1a2   :  { %365 = vst [vmem:[#allocation9] sm:$0x1] %v364_v37 }
 0x1a3   :  { %491 = shalt.err (!%p488_p0)
}
 0x1a4   :  { %375 = dma.vmem_to_hbm [thread:$0]  %s373_s13, 16, %s702_s4, [#allocation4]  }
 0x1a5   :  { %506 = dma.done.wait [#allocation4], 16  }
 0x1a6   :  { %507 = vsyncadd [#allocation4], 4294967280 }
 0x1a7   :  { %379 = vsyncpa [#allocation3], 1 }
 0x1a8   :  { %380 = vsyncpa [#allocation8], 1 }
 0x1a9   :  { %381 = vsyncpa [#allocation4], 1 }
 0x1aa   :  { %382 = vsyncpa [#allocation5], 1 }

</bundles_post_ra>
